<compile_context>
chip_gen: v6e
topology: v6e:2x2x1
jax: 0.10.0
libtpu: 0.0.40
codegen_flags: <defaults>
</compile_context>

<pallas_src>
import jax
import jax.numpy as jnp
from jax.experimental import pallas as pl
from jax.experimental.pallas import tpu as pltpu


EPS = 1e-5


# ----------------------------------------------------------------------------- kernels
def _cbn_kernel_table(x_ref, onehot_ref, gamma_t_ref, beta_t_ref, o_ref):
    # x_ref:       (B, TILE_F)  feature-column tile of the input
    # onehot_ref:  (B, C)       one-hot of labels (tiny, resident every step)
    # gamma_t_ref: (C, TILE_F)  column slice of embed.weight[:, :F]
    # beta_t_ref:  (C, TILE_F)  column slice of embed.weight[:, F:]
    x = x_ref[...].astype(jnp.float32)
    inv_b = jnp.float32(1.0 / x.shape[0])

    # Batch statistics over axis 0 (biased variance, as BatchNorm uses for normalization).
    mean = jnp.sum(x, axis=0, keepdims=True) * inv_b
    centered = x - mean
    var = jnp.sum(centered * centered, axis=0, keepdims=True) * inv_b
    x_hat = centered * jax.lax.rsqrt(var + EPS)

    # Exact in-kernel embedding gather: unrolled f32 select/accumulate over the
    # (small) class axis.  onehot entries are exactly 0.0 / 1.0, so this is
    # bit-exact vs a reference gather (no MXU bf16 truncation).
    onehot = onehot_ref[...].astype(jnp.float32)          # (B, C)
    gt = gamma_t_ref[...].astype(jnp.float32)             # (C, TILE_F)
    bt = beta_t_ref[...].astype(jnp.float32)               # (C, TILE_F)
    num_classes = gt.shape[0]

    gamma = jnp.zeros_like(x)
    beta = jnp.zeros_like(x)
    for c in range(num_classes):                            # static trip count (<= 32)
        oh_c = onehot[:, c:c + 1]                           # (B, 1), exact 0/1
        gamma = gamma + oh_c * gt[c:c + 1, :]
        beta = beta + oh_c * bt[c:c + 1, :]

    o_ref[...] = (gamma * x_hat + beta).astype(o_ref.dtype)


def _cbn_kernel_gathered(x_ref, gamma_ref, beta_ref, o_ref):
    # x_ref/gamma_ref/beta_ref/o_ref: (B, TILE_F); gamma/beta pre-gathered per row.
    x = x_ref[...].astype(jnp.float32)
    inv_b = jnp.float32(1.0 / x.shape[0])

    mean = jnp.sum(x, axis=0, keepdims=True) * inv_b
    centered = x - mean
    var = jnp.sum(centered * centered, axis=0, keepdims=True) * inv_b
    x_hat = centered * jax.lax.rsqrt(var + EPS)

    o_ref[...] = (gamma_ref[...].astype(jnp.float32) * x_hat
                  + beta_ref[...].astype(jnp.float32)).astype(o_ref.dtype)


# ----------------------------------------------------------------------------- sizing
def _vmem_budget_bytes():
    """Per-generation VMEM budget: ~75% of physical, capped at 100 MiB."""
    cap = None
    try:
        cap = getattr(pltpu.get_tpu_info(), "vmem_capacity_bytes", None)
    except Exception:
        cap = None
    if not cap:
        try:
            kind = jax.devices()[0].device_kind.lower()
        except Exception:
            kind = ""
        # v7x has 64 MiB per TensorCore; v5e/v6e have 128 MiB.
        cap = 64 * 1024 * 1024 if "7" in kind else 128 * 1024 * 1024
    return int(min(cap * 3 // 4, 100 * 1024 * 1024))


def _pick_tile_f(f_pad, batch, num_classes, x_bytes, out_bytes, table_path, budget_bytes):
    """Largest multiple-of-128 divisor of f_pad that fits the VMEM budget,
    preferring >= 2 tiles (so v7x's two TensorCores both get work)."""
    # Bytes of VMEM working set per feature column:
    per_f = 2 * batch * x_bytes                 # x, double-buffered
    per_f += 2 * batch * out_bytes              # out, double-buffered
    if table_path:
        per_f += 2 * 2 * num_classes * 4        # gamma/beta table slices, double-buffered
    else:
        per_f += 2 * 2 * batch * 4              # pre-gathered gamma/beta blocks, double-buffered
    per_f += 6 * batch * 4                      # f32 temporaries (x32/centered/x_hat/gamma/beta/out)
    fixed = 2 * batch * num_classes * 4 if table_path else 0   # resident one-hot

    avail = max(budget_bytes - fixed, 128 * per_f)
    max_tile = max(128, (avail // max(per_f, 1)) // 128 * 128)
    # Past a few MiB per buffer the ~0.35us/step overhead is already <1%; keep the
    # tile moderate so vreg/VMEM pressure from the f32 temporaries stays sane.
    max_tile = min(max_tile, 16384)

    best = 128
    t = 128
    while t <= min(f_pad, max_tile):
        if f_pad % t == 0:
            best = t
        t += 128

    # Prefer >= 2 grid steps on the "parallel" feature axis when F allows it.
    if best == f_pad and f_pad >= 256:
        half = 128
        t = 128
        while t <= f_pad // 2:
            if f_pad % t == 0:
                half = t
            t += 128
        best = half
    return best


# ----------------------------------------------------------------------------- wrapper
def conditional_batch_norm_1d(x, labels, embed_weight, num_features):
    """x: (B, F) float, labels: (B,) int, embed_weight: (num_classes, 2F)."""
    batch, feats = x.shape
    assert feats == num_features
    num_classes = embed_weight.shape[0]
    assert embed_weight.shape == (num_classes, 2 * num_features)

    budget = _vmem_budget_bytes()
    # Table path (in-kernel gather) only pays when C <= B; the exact unrolled
    # accumulate additionally wants a small C.  Otherwise pre-gather per row.
    table_path = (num_classes <= batch) and (num_classes <= 32)

    # Pad the feature axis to a multiple of 128 for lane-dense blocks.
    f_pad = ((feats + 127) // 128) * 128
    tile_f = _pick_tile_f(f_pad, batch, num_classes, x.dtype.itemsize,
                          x.dtype.itemsize, table_path, budget)
    n_tiles = f_pad // tile_f

    x_p = x if f_pad == feats else jnp.pad(x, ((0, 0), (0, f_pad - feats)))

    compiler_params = pltpu.CompilerParams(
        dimension_semantics=("parallel",),   # feature tiles are independent
        vmem_limit_bytes=budget,
    )

    if table_path:
        gamma_table = embed_weight[:, :num_features]       # (C, F)
        beta_table = embed_weight[:, num_features:]        # (C, F)
        if f_pad != feats:
            gamma_table = jnp.pad(gamma_table, ((0, 0), (0, f_pad - feats)))
            beta_table = jnp.pad(beta_table, ((0, 0), (0, f_pad - feats)))
        onehot = jax.nn.one_hot(labels, num_classes, dtype=jnp.float32)  # (B, C)

        out = pl.pallas_call(
            _cbn_kernel_table,
            out_shape=jax.ShapeDtypeStruct((batch, f_pad), x.dtype),
            grid_spec=pltpu.PrefetchScalarGridSpec(
                num_scalar_prefetch=0,
                grid=(n_tiles,),
                in_specs=[
                    pl.BlockSpec((batch, tile_f), lambda i: (0, i)),            # x column tile
                    pl.BlockSpec((batch, num_classes), lambda i: (0, 0)),       # one-hot (tiny)
                    pl.BlockSpec((num_classes, tile_f), lambda i: (0, i)),      # gamma table slice
                    pl.BlockSpec((num_classes, tile_f), lambda i: (0, i)),      # beta table slice
                ],
                out_specs=pl.BlockSpec((batch, tile_f), lambda i: (0, i)),
            ),
            compiler_params=compiler_params,
        )(x_p, onehot, gamma_table, beta_table)
    else:
        emb = jnp.take(embed_weight, labels, axis=0)        # (B, 2F), exact gather
        gamma = emb[:, :num_features]
        beta = emb[:, num_features:]
        if f_pad != feats:
            gamma = jnp.pad(gamma, ((0, 0), (0, f_pad - feats)))
            beta = jnp.pad(beta, ((0, 0), (0, f_pad - feats)))

        out = pl.pallas_call(
            _cbn_kernel_gathered,
            out_shape=jax.ShapeDtypeStruct((batch, f_pad), x.dtype),
            grid_spec=pltpu.PrefetchScalarGridSpec(
                num_scalar_prefetch=0,
                grid=(n_tiles,),
                in_specs=[
                    pl.BlockSpec((batch, tile_f), lambda i: (0, i)),   # x column tile
                    pl.BlockSpec((batch, tile_f), lambda i: (0, i)),   # gamma rows
                    pl.BlockSpec((batch, tile_f), lambda i: (0, i)),   # beta rows
                ],
                out_specs=pl.BlockSpec((batch, tile_f), lambda i: (0, i)),
            ),
            compiler_params=compiler_params,
        )(x_p, gamma, beta)

    if f_pad != feats:
        out = out[:, :feats]
    return out


# ----------------------------------------------------------------------------- reference
def _reference(x, labels, embed_weight, num_features):
    x32 = x.astype(jnp.float32)
    mean = jnp.mean(x32, axis=0, keepdims=True)
    var = jnp.mean((x32 - mean) ** 2, axis=0, keepdims=True)
    x_hat = (x32 - mean) / jnp.sqrt(var + EPS)
    emb = jnp.take(embed_weight, labels, axis=0)
    gamma = emb[:, :num_features]
    beta = emb[:, num_features:]
    return (gamma * x_hat + beta).astype(x.dtype)


if __name__ == "__main__":
    num_features = 128
    num_classes = 4
    batch_size = 8

    key = jax.random.PRNGKey(0)
    kx, klab, kemb = jax.random.split(key, 3)

    # Inputs: x (B, F) float32, labels (B,) int32.
    x = jax.random.normal(kx, (batch_size, num_features), dtype=jnp.float32)
    labels = jax.random.randint(klab, (batch_size,), 0, num_classes, dtype=jnp.int32)

    # Parameter init matching the module's __init__:
    #   embed.weight[:, :F] ~ Normal(1, 1/sqrt(F)),  embed.weight[:, F:] = 0
    gamma_init = 1.0 + (1.0 / jnp.sqrt(jnp.float32(num_features))) * jax.random.normal(
        kemb, (num_classes, num_features), dtype=jnp.float32
    )
    beta_init = jnp.zeros((num_classes, num_features), dtype=jnp.float32)
    embed_weight = jnp.concatenate([gamma_init, beta_init], axis=1)  # (C, 2F)

    out = conditional_batch_norm_1d(x, labels, embed_weight, num_features)
    out = jax.block_until_ready(out)

    ref = _reference(x, labels, embed_weight, num_features)
    assert out.shape == (batch_size, num_features)
    assert jnp.allclose(out, ref, atol=1e-5, rtol=1e-5)

    print("KERNEL_OK")
</pallas_src>

<mosaic_0001>
module attributes {stable_mosaic.version = 11 : i64} {
  func.func @_cbn_kernel_table(%arg0: i32, %arg1: memref<8x128xf32, #tpu.memory_space<vmem>>, %arg2: memref<8x4xf32, #tpu.memory_space<vmem>>, %arg3: memref<4x128xf32, #tpu.memory_space<vmem>>, %arg4: memref<4x128xf32, #tpu.memory_space<vmem>>, %arg5: memref<8x128xf32, #tpu.memory_space<vmem>>) attributes {dimension_semantics = [#tpu.dimension_semantics<parallel>], iteration_bounds = array<i64: 1>, scalar_prefetch = 0 : i64, scratch_operands = 0 : i64, tpu.core_type = #tpu.core_type<tc>, window_params = [{transform_indices = @transform_0, window_bounds = array<i64: 8, 128>}, {pipeline_mode = #tpu.pipeline_mode<synchronous>, transform_indices = @transform_1, window_bounds = array<i64: 8, 4>}, {transform_indices = @transform_2, window_bounds = array<i64: 4, 128>}, {transform_indices = @transform_3, window_bounds = array<i64: 4, 128>}, {transform_indices = @transform_4, window_bounds = array<i64: 8, 128>}]} {
    %c0 = arith.constant 0 : index
    %c0_0 = arith.constant 0 : index
    %0 = vector.load %arg1[%c0, %c0_0] : memref<8x128xf32, #tpu.memory_space<vmem>>, vector<8x128xf32>
    %cst = arith.constant dense<0.000000e+00> : vector<128xf32>
    %1 = vector.multi_reduction <add>, %0, %cst [0] : vector<8x128xf32> to vector<128xf32>
    %2 = vector.shape_cast %1 : vector<128xf32> to vector<1x128xf32>
    %cst_1 = arith.constant 1.250000e-01 : f32
    %3 = vector.broadcast %cst_1 : f32 to vector<1x128xf32>
    %4 = arith.mulf %2, %3 : vector<1x128xf32>
    %5 = vector.broadcast %4 : vector<1x128xf32> to vector<8x128xf32>
    %6 = arith.subf %0, %5 : vector<8x128xf32>
    %7 = arith.mulf %6, %6 : vector<8x128xf32>
    %cst_2 = arith.constant dense<0.000000e+00> : vector<128xf32>
    %8 = vector.multi_reduction <add>, %7, %cst_2 [0] : vector<8x128xf32> to vector<128xf32>
    %9 = vector.shape_cast %8 : vector<128xf32> to vector<1x128xf32>
    %cst_3 = arith.constant 1.250000e-01 : f32
    %10 = vector.broadcast %cst_3 : f32 to vector<1x128xf32>
    %11 = arith.mulf %9, %10 : vector<1x128xf32>
    %cst_4 = arith.constant 9.99999974E-6 : f32
    %12 = vector.broadcast %cst_4 : f32 to vector<1x128xf32>
    %13 = arith.addf %11, %12 : vector<1x128xf32>
    %14 = math.rsqrt %13 : vector<1x128xf32>
    %15 = vector.broadcast %14 : vector<1x128xf32> to vector<8x128xf32>
    %16 = arith.mulf %6, %15 : vector<8x128xf32>
    %c0_5 = arith.constant 0 : index
    %c0_6 = arith.constant 0 : index
    %17 = vector.load %arg2[%c0_5, %c0_6] : memref<8x4xf32, #tpu.memory_space<vmem>>, vector<8x4xf32>
    %c0_7 = arith.constant 0 : index
    %c0_8 = arith.constant 0 : index
    %18 = vector.load %arg3[%c0_7, %c0_8] : memref<4x128xf32, #tpu.memory_space<vmem>>, vector<4x128xf32>
    %c0_9 = arith.constant 0 : index
    %c0_10 = arith.constant 0 : index
    %19 = vector.load %arg4[%c0_9, %c0_10] : memref<4x128xf32, #tpu.memory_space<vmem>>, vector<4x128xf32>
    %cst_11 = arith.constant 0.000000e+00 : f32
    %20 = vector.broadcast %cst_11 : f32 to vector<8x128xf32>
    %cst_12 = arith.constant 0.000000e+00 : f32
    %21 = vector.broadcast %cst_12 : f32 to vector<8x128xf32>
    %22 = vector.extract_strided_slice %17 {offsets = [0, 0], sizes = [8, 1], strides = [1, 1]} : vector<8x4xf32> to vector<8x1xf32>
    %23 = vector.extract_strided_slice %18 {offsets = [0, 0], sizes = [1, 128], strides = [1, 1]} : vector<4x128xf32> to vector<1x128xf32>
    %24 = vector.broadcast %22 : vector<8x1xf32> to vector<8x128xf32>
    %25 = vector.broadcast %23 : vector<1x128xf32> to vector<8x128xf32>
    %26 = arith.mulf %24, %25 : vector<8x128xf32>
    %27 = arith.addf %20, %26 : vector<8x128xf32>
    %28 = vector.extract_strided_slice %19 {offsets = [0, 0], sizes = [1, 128], strides = [1, 1]} : vector<4x128xf32> to vector<1x128xf32>
    %29 = vector.broadcast %22 : vector<8x1xf32> to vector<8x128xf32>
    %30 = vector.broadcast %28 : vector<1x128xf32> to vector<8x128xf32>
    %31 = arith.mulf %29, %30 : vector<8x128xf32>
    %32 = arith.addf %21, %31 : vector<8x128xf32>
    %33 = vector.extract_strided_slice %17 {offsets = [0, 1], sizes = [8, 1], strides = [1, 1]} : vector<8x4xf32> to vector<8x1xf32>
    %34 = vector.extract_strided_slice %18 {offsets = [1, 0], sizes = [1, 128], strides = [1, 1]} : vector<4x128xf32> to vector<1x128xf32>
    %35 = vector.broadcast %33 : vector<8x1xf32> to vector<8x128xf32>
    %36 = vector.broadcast %34 : vector<1x128xf32> to vector<8x128xf32>
    %37 = arith.mulf %35, %36 : vector<8x128xf32>
    %38 = arith.addf %27, %37 : vector<8x128xf32>
    %39 = vector.extract_strided_slice %19 {offsets = [1, 0], sizes = [1, 128], strides = [1, 1]} : vector<4x128xf32> to vector<1x128xf32>
    %40 = vector.broadcast %33 : vector<8x1xf32> to vector<8x128xf32>
    %41 = vector.broadcast %39 : vector<1x128xf32> to vector<8x128xf32>
    %42 = arith.mulf %40, %41 : vector<8x128xf32>
    %43 = arith.addf %32, %42 : vector<8x128xf32>
    %44 = vector.extract_strided_slice %17 {offsets = [0, 2], sizes = [8, 1], strides = [1, 1]} : vector<8x4xf32> to vector<8x1xf32>
    %45 = vector.extract_strided_slice %18 {offsets = [2, 0], sizes = [1, 128], strides = [1, 1]} : vector<4x128xf32> to vector<1x128xf32>
    %46 = vector.broadcast %44 : vector<8x1xf32> to vector<8x128xf32>
    %47 = vector.broadcast %45 : vector<1x128xf32> to vector<8x128xf32>
    %48 = arith.mulf %46, %47 : vector<8x128xf32>
    %49 = arith.addf %38, %48 : vector<8x128xf32>
    %50 = vector.extract_strided_slice %19 {offsets = [2, 0], sizes = [1, 128], strides = [1, 1]} : vector<4x128xf32> to vector<1x128xf32>
    %51 = vector.broadcast %44 : vector<8x1xf32> to vector<8x128xf32>
    %52 = vector.broadcast %50 : vector<1x128xf32> to vector<8x128xf32>
    %53 = arith.mulf %51, %52 : vector<8x128xf32>
    %54 = arith.addf %43, %53 : vector<8x128xf32>
    %55 = vector.extract_strided_slice %17 {offsets = [0, 3], sizes = [8, 1], strides = [1, 1]} : vector<8x4xf32> to vector<8x1xf32>
    %56 = vector.extract_strided_slice %18 {offsets = [3, 0], sizes = [1, 128], strides = [1, 1]} : vector<4x128xf32> to vector<1x128xf32>
    %57 = vector.broadcast %55 : vector<8x1xf32> to vector<8x128xf32>
    %58 = vector.broadcast %56 : vector<1x128xf32> to vector<8x128xf32>
    %59 = arith.mulf %57, %58 : vector<8x128xf32>
    %60 = arith.addf %49, %59 : vector<8x128xf32>
    %61 = vector.extract_strided_slice %19 {offsets = [3, 0], sizes = [1, 128], strides = [1, 1]} : vector<4x128xf32> to vector<1x128xf32>
    %62 = vector.broadcast %55 : vector<8x1xf32> to vector<8x128xf32>
    %63 = vector.broadcast %61 : vector<1x128xf32> to vector<8x128xf32>
    %64 = arith.mulf %62, %63 : vector<8x128xf32>
    %65 = arith.addf %54, %64 : vector<8x128xf32>
    %66 = arith.mulf %60, %16 : vector<8x128xf32>
    %67 = arith.addf %66, %65 : vector<8x128xf32>
    %c0_13 = arith.constant 0 : index
    %c0_14 = arith.constant 0 : index
    %68 = vector.load %arg5[%c0_13, %c0_14] : memref<8x128xf32, #tpu.memory_space<vmem>>, vector<8x128xf32>
    tpu.vector_store %arg5[%c0_13, %c0_14], %67 {strides = array<i32>} : memref<8x128xf32, #tpu.memory_space<vmem>>, vector<8x128xf32>,
    return
  }
  func.func @transform_0(%arg0: i32) -> (i32, i32) {
    %c0_i32 = arith.constant 0 : i32
    %c0_i32_0 = arith.constant 0 : i32
    return %c0_i32, %arg0 : i32, i32
  }
  func.func @transform_1(%arg0: i32) -> (i32, i32) {
    %c0_i32 = arith.constant 0 : i32
    %c0_i32_0 = arith.constant 0 : i32
    %c0_i32_1 = arith.constant 0 : i32
    return %c0_i32, %c0_i32_0 : i32, i32
  }
  func.func @transform_2(%arg0: i32) -> (i32, i32) {
    %c0_i32 = arith.constant 0 : i32
    %c0_i32_0 = arith.constant 0 : i32
    return %c0_i32, %arg0 : i32, i32
  }
  func.func @transform_3(%arg0: i32) -> (i32, i32) {
    %c0_i32 = arith.constant 0 : i32
    %c0_i32_0 = arith.constant 0 : i32
    return %c0_i32, %arg0 : i32, i32
  }
  func.func @transform_4(%arg0: i32) -> (i32, i32) {
    %c0_i32 = arith.constant 0 : i32
    %c0_i32_0 = arith.constant 0 : i32
    return %c0_i32, %arg0 : i32, i32
  }
}

</mosaic_0001>

<bundles_post_ra>
// kernel: tpu_custom_call.1
= control target key start
LH: loop header
LB: loop body
LE: loop exit
PB: predicated region body
PF: predicated region fallthrough
CT: control target
= control target key end

     0   :  { %v157_v1 = vmov 0   ;;  %v158_v2 = vmov 2   ;;  %s202_s0 = inlined_call_operand.vmem [shape: f32[8,128], index: 0, kind: input, shape index: {}]   ;;  %s203_s1 = inlined_call_operand.vmem [shape: f32[8,4], index: 1, kind: input, shape index: {}]   ;;  %s204_s2 = inlined_call_operand.vmem [shape: f32[4,128], index: 2, kind: input, shape index: {}]   ;;  %s205_s3 = inlined_call_operand.vmem [shape: f32[4,128], index: 3, kind: input, shape index: {}]   ;;  %s206_s4 = inlined_call_operand.hbm [shape: f32[8,128], index: 4, kind: output, shape index: {}]  }
   0x1   :  { %v38_v0 = vld [vmem:[%s203_s1] sm:$0xff]  ;;  %128 = vset.pattern.permute.xlu0 %v157_v1  ;;  %130 = vset.pattern.permute.xlu1 %v158_v2 }
   0x2   :  { %9 = vsyncpa [#allocation3], 0  ;;  %43 = vperm.xlu0 %128, %v38_v0   ;;  %75 = vperm.xlu1 %130, %v38_v0   ;;  %v159_v3 = vmov 1   ;;  %v160_v4 = vmov 3   ;;  %v18_v5 = vld [vmem:[%s202_s0] sm:$0xff]  ;;  %v46_v22 = vlaneseq }
   0x3   :  { %v19_v6 = vrot.slane %v18_v5, 4  ;;  %v39_v27 = vld [vmem:[%s204_s2] sm:$0xf]  ;;  %s161_s2 = smov [#allocation2]  }
   0x4   :  { %v47_v24 = vshrl.u32 %v46_v22, 7  ;;  %v40_v28 = vld [vmem:[%s205_s3] sm:$0xf]  ;;  %s115_s3 = sshll.u32 %s161_s2, 4  ;;  %s116_s3 = int_to_ptr.vmem [resolvable:$true] %s115_s3 }
   0x5   :  { %v20_v7 = vadd.f32 %v19_v6, %v18_v5  ;;  %s135_s21 = scalar_lea.vmem %s116_s3, 128  ;;  %p140_p1 = scmp.lt.s32.totalorder %s116_s3, %s116_s3 }
   0x6   :  { %129 = vset.pattern.permute.xlu0 %v159_v3  ;;  %131 = vset.pattern.permute.xlu1 %v160_v4  ;;  %v48_v25 = vsub.s32 0, %v47_v24  ;;  %v64_v26 = vsub.s32 1, %v47_v24  ;;  %v80_v29 = vsub.s32 2, %v47_v24  ;;  %v96_v32 = vsub.s32 3, %v47_v24  ;;  %p136_p0 = scmp.ne.s32.totalorder %s116_s3, %s135_s21  ;;  %p141_p2 = scmp.lt.s32.totalorder %s135_s21, %s135_s21 }
   0x7   :  { %59 = vperm.xlu0 %129, %v38_v0   ;;  %91 = vperm.xlu1 %131, %v38_v0   ;;  %v21_v8 = vrot.slane %v20_v7, 2 }
   0x8   :  { %v49_v33 = vrot.slane %v39_v27, %v48_v25  ;;  %v55_v34 = vrot.slane %v40_v28, %v48_v25  ;;  %v65_v35 = vrot.slane %v39_v27, %v64_v26  ;;  %v71_v36 = vrot.slane %v40_v28, %v64_v26  ;;  %p142_p3 = por %p141_p2, %p140_p1 }
   0x9   :  { %v22_v9 = vadd.f32 %v21_v8, %v20_v7  ;;  %v81_v37 = vrot.slane %v39_v27, %v80_v29  ;;  %v87_v38 = vrot.slane %v40_v28, %v80_v29  ;;  %v97_v39 = vrot.slane %v39_v27, %v96_v32 }
   0xa   :  { %v103_v41 = vrot.slane %v40_v28, %v96_v32  ;;  %p143_p4 = pnand %p142_p3, %p136_p0 }
   0xb   :  { %132 = vset.pattern.permute.xlu0 %v160_v4  ;;  %v23_v10 = vrot.slane %v22_v9, 1 }
   0xd   :  { %v24_v11 = vadd.f32 %v23_v10, %v22_v9 }
   0xf   :  { %v25_v12 = vmul.f32 0.125, %v24_v11 }
  0x11   :  { %v26_v13 = vsub.f32 %v18_v5, %v25_v12 }
  0x13   :  { %v27_v14 = vmul.f32 %v26_v13, %v26_v13 }
  0x15   :  { %v28_v15 = vrot.slane %v27_v14, 4 }
  0x17   :  { %v29_v16 = vadd.f32 %v28_v15, %v27_v14 }
  0x19   :  { %v30_v17 = vrot.slane %v29_v16, 2 }
  0x1b   :  { %v31_v18 = vadd.f32 %v30_v17, %v29_v16 }
  0x1d   :  { %v32_v19 = vrot.slane %v31_v18, 1 }
  0x1f   :  { %v33_v20 = vadd.f32 %v32_v19, %v31_v18 }
  0x21   :  { %v34_v21 = vmul.f32 0.125, %v33_v20 }
  0x23   :  { %v35_v23 = vadd.f32 1e-05, %v34_v21 }
  0x25   :  { %133 = vrsqrt.f32 %v35_v23 }
  0x32   :  { %v134_v47 = vpop.eup %133 }
  0x33   :  { %v37_v56 = vmul.f32 %v134_v47, %v26_v13 }
  0x7d   :  { %v44_v30 = vpop.permute.xlu0 %43  ;;  %v76_v31 = vpop.permute.xlu1 %75 }
  0x7e   :  { %v50_v43 = vmul.f32 %v49_v33, %v44_v30  ;;  %v56_v44 = vmul.f32 %v55_v34, %v44_v30  ;;  %v82_v48 = vmul.f32 %v81_v37, %v76_v31  ;;  %v88_v49 = vmul.f32 %v87_v38, %v76_v31 }
  0x82   :  { %v60_v40 = vpop.permute.xlu0 %59  ;;  %v92_v42 = vpop.permute.xlu1 %91 }
  0x83   :  { %v66_v45 = vmul.f32 %v65_v35, %v60_v40  ;;  %v72_v46 = vmul.f32 %v71_v36, %v60_v40  ;;  %v98_v52 = vmul.f32 %v97_v39, %v92_v42  ;;  %v104_v55 = vmul.f32 %v103_v41, %v92_v42 }
  0x85   :  { %v67_v50 = vadd.f32 %v66_v45, %v50_v43  ;;  %v73_v51 = vadd.f32 %v72_v46, %v56_v44 }
  0x87   :  { %v83_v53 = vadd.f32 %v82_v48, %v67_v50  ;;  %v89_v54 = vadd.f32 %v88_v49, %v73_v51 }
  0x89   :  { %v99_v57 = vadd.f32 %v98_v52, %v83_v53  ;;  %v105_v58 = vadd.f32 %v104_v55, %v89_v54 }
  0x8b   :  { %v106_v59 = vmul.f32 %v99_v57, %v37_v56 }
  0x8d   :  { %v107_v60 = vadd.f32 %v106_v59, %v105_v58 }
  0x8f   :  { %108 = vst [vmem:[#allocation2] sm:$0xff] %v107_v60 }
  0x90   :  { %146 = shalt.err (!%p143_p4)
}
  0x91   :  { %118 = dma.vmem_to_hbm [thread:$0]  %s116_s3, 128, %s206_s4, [#allocation3]  }
  0x92   :  { %155 = dma.done.wait [#allocation3], 128  }
  0x93   :  { %156 = vsyncadd [#allocation3], 4294967168 }
  0x94   :  { %122 = vsyncpa [#allocation3], 1 }

</bundles_post_ra>
